<compile_context>
chip_gen: v6e
topology: v6e:2x2x1
jax: 0.10.0
libtpu: 0.0.40
codegen_flags: <defaults>
</compile_context>

<pallas_src>
import functools

import jax
import jax.numpy as jnp
from jax.experimental import pallas as pl
from jax.experimental.pallas import tpu as pltpu

HIDDEN = 200      # logical hidden width (nn.Linear(N1, 200))
HIDDEN_P = 256    # lane-aligned padded hidden width (multiple of 128)
ZERO_PAD = 4      # forward() concatenates 4 zero channels on the last dim
LANE = 128


def _round_up(x, m):
    return ((x + m - 1) // m) * m


def _odefunc_kernel(y_ref, w1_ref, b1_ref, w2_ref, b2_ref, w3_ref, b3_ref,
                    w4_ref, b4_ref, o_ref):
    """One row-tile of the 4-layer MLP, all operands lane-aligned in VMEM.

    Matmuls run in the weight dtype (f32 or bf16) with f32 accumulation on the
    MXU; sigmoids stay in f32 on the EUP. The zero-padded columns of W4/b4
    produce the trailing zero channels directly, so no concat / partial store.
    """
    mm_dtype = w1_ref.dtype

    y = y_ref[...].astype(mm_dtype)
    h = jnp.dot(y, w1_ref[...], preferred_element_type=jnp.float32) + b1_ref[...]
    h = jax.nn.sigmoid(h)
    h = jnp.dot(h.astype(mm_dtype), w2_ref[...],
                preferred_element_type=jnp.float32) + b2_ref[...]
    h = jax.nn.sigmoid(h)
    h = jnp.dot(h.astype(mm_dtype), w3_ref[...],
                preferred_element_type=jnp.float32) + b3_ref[...]
    h = jax.nn.sigmoid(h)
    out = jnp.dot(h.astype(mm_dtype), w4_ref[...],
                  preferred_element_type=jnp.float32) + b4_ref[...]

    o_ref[...] = out.astype(o_ref.dtype)


def _choose_tm(B, tm_max):
    """Large row tile for MXU utilization, but keep grid >= 2 (v7x megacore)
    whenever B is big enough to split."""
    half = _round_up(max(1, -(-B // 2)), 8)   # ceil(B/2) rounded up to sublane
    return max(8, min(tm_max, half))


@functools.partial(jax.jit, static_argnames=("tm_max", "use_bf16"))
def odefunc_forward(y, params, *, tm_max=256, use_bf16=False):
    """y: (M, K, N1) float32.  Returns (M, K, N2 + 4) — same as ODEFunc.forward."""
    w1, b1, w2, b2, w3, b3, w4, b4 = params
    M, K, N1 = y.shape
    N2 = w4.shape[1]
    N_out = N2 + ZERO_PAD
    N_out_p = _round_up(N_out, LANE)          # lane-dense output slab

    mm_dtype = jnp.bfloat16 if use_bf16 else jnp.float32
    f32 = jnp.float32

    # Zero-pad weights/biases to lane-aligned shapes. Zero padding keeps the math
    # exact: padded hidden lanes see sigmoid(0)=0.5 but the matching *rows* of the
    # next weight matrix are zero, so they contribute nothing; padded output
    # columns of W4/b4 are zero, which realizes torch.cat((out, zeros(...,4))) for
    # free (plus extra zero lanes that are sliced off below).
    w1p = jnp.zeros((N1, HIDDEN_P), mm_dtype).at[:, :HIDDEN].set(w1.astype(mm_dtype))
    w2p = jnp.zeros((HIDDEN_P, HIDDEN_P), mm_dtype).at[:HIDDEN, :HIDDEN].set(w2.astype(mm_dtype))
    w3p = jnp.zeros((HIDDEN_P, HIDDEN_P), mm_dtype).at[:HIDDEN, :HIDDEN].set(w3.astype(mm_dtype))
    w4p = jnp.zeros((HIDDEN_P, N_out_p), mm_dtype).at[:HIDDEN, :N2].set(w4.astype(mm_dtype))
    b1p = jnp.zeros((1, HIDDEN_P), f32).at[:, :HIDDEN].set(b1.astype(f32).reshape(1, -1))
    b2p = jnp.zeros((1, HIDDEN_P), f32).at[:, :HIDDEN].set(b2.astype(f32).reshape(1, -1))
    b3p = jnp.zeros((1, HIDDEN_P), f32).at[:, :HIDDEN].set(b3.astype(f32).reshape(1, -1))
    b4p = jnp.zeros((1, N_out_p), f32).at[:, :N2].set(b4.astype(f32).reshape(1, -1))

    # Flatten (M, K) -> rows and pad the row count up to the row tile.
    B = M * K
    y2 = y.reshape(B, N1)
    tm = _choose_tm(B, tm_max)
    Bp = _round_up(B, tm)
    if Bp != B:
        y2 = jnp.pad(y2, ((0, Bp - B), (0, 0)))
    grid = (Bp // tm,)

    def row_map(i):
        return (i, 0)

    def full_map(i):
        return (0, 0)

    cost = pl.CostEstimate(
        flops=2 * Bp * (N1 * HIDDEN_P + 2 * HIDDEN_P * HIDDEN_P + HIDDEN_P * N_out_p),
        transcendentals=3 * Bp * HIDDEN_P,
        bytes_accessed=4 * (Bp * N1 + Bp * N_out_p
                            + N1 * HIDDEN_P + 2 * HIDDEN_P * HIDDEN_P
                            + HIDDEN_P * N_out_p + 3 * HIDDEN_P + N_out_p),
    )

    out2 = pl.pallas_call(
        _odefunc_kernel,
        out_shape=jax.ShapeDtypeStruct((Bp, N_out_p), y.dtype),
        grid_spec=pltpu.PrefetchScalarGridSpec(
            num_scalar_prefetch=0,
            grid=grid,
            in_specs=[
                pl.BlockSpec((tm, N1), row_map),               # y rows
                pl.BlockSpec((N1, HIDDEN_P), full_map),        # W1 (padded)
                pl.BlockSpec((1, HIDDEN_P), full_map),         # b1
                pl.BlockSpec((HIDDEN_P, HIDDEN_P), full_map),  # W2
                pl.BlockSpec((1, HIDDEN_P), full_map),         # b2
                pl.BlockSpec((HIDDEN_P, HIDDEN_P), full_map),  # W3
                pl.BlockSpec((1, HIDDEN_P), full_map),         # b3
                pl.BlockSpec((HIDDEN_P, N_out_p), full_map),   # W4 (padded cols)
                pl.BlockSpec((1, N_out_p), full_map),          # b4
            ],
            out_specs=pl.BlockSpec((tm, N_out_p), row_map),
        ),
        compiler_params=pltpu.CompilerParams(
            dimension_semantics=("parallel",)),
        cost_estimate=cost,
    )(y2, w1p, b1p, w2p, b2p, w3p, b3p, w4p, b4p)

    return out2[:B, :N_out].reshape(M, K, N_out)


def init_params(key, N1, N2, dtype=jnp.float32):
    """Matches nn.init.normal_(std=0.1) weights and zero biases.
    Weights stored (in, out): y @ W_io + b == PyTorch's y @ W.T + b."""
    ks = jax.random.split(key, 4)
    dims = [(N1, HIDDEN), (HIDDEN, HIDDEN), (HIDDEN, HIDDEN), (HIDDEN, N2)]
    params = []
    for k, (din, dout) in zip(ks, dims):
        w = (0.1 * jax.random.normal(k, (din, dout))).astype(dtype)
        b = jnp.zeros((1, dout), dtype=dtype)
        params.extend([w, b])
    return tuple(params)


def _reference(y, params):
    w1, b1, w2, b2, w3, b3, w4, b4 = params
    h = jax.nn.sigmoid(y @ w1 + b1[0])
    h = jax.nn.sigmoid(h @ w2 + b2[0])
    h = jax.nn.sigmoid(h @ w3 + b3[0])
    out = h @ w4 + b4[0]
    M, K, _ = y.shape
    return jnp.concatenate(
        [out, jnp.zeros((M, K, ZERO_PAD), dtype=out.dtype)], axis=-1)


if __name__ == "__main__":
    key = jax.random.PRNGKey(0)
    kp, ky, ky2 = jax.random.split(key, 3)

    # Small ODE state, consistent with the module interface: y is (M, K, N1).
    M, K, N1, N2 = 2, 4, 8, 4
    params = init_params(kp, N1, N2)
    y = jax.random.normal(ky, (M, K, N1), dtype=jnp.float32)

    t = jnp.float32(0.0)  # unused by the forward pass (kept for ODE interface)
    out = odefunc_forward(y, params)
    out = jax.block_until_ready(out)

    ref = _reference(y, params)
    assert out.shape == (M, K, N2 + ZERO_PAD), out.shape
    assert jnp.allclose(out, ref, atol=1e-5, rtol=1e-5), "mismatch vs reference (small)"

    # Larger batch to exercise the 256-row tile / multi-step grid path.
    Mb, Kb = 64, 32   # B = 2048 rows -> tm = 256, grid = (8,)
    yb = jax.random.normal(ky2, (Mb, Kb, N1), dtype=jnp.float32)
    outb = jax.block_until_ready(odefunc_forward(yb, params))
    refb = _reference(yb, params)
    assert outb.shape == (Mb, Kb, N2 + ZERO_PAD), outb.shape
    assert jnp.allclose(outb, refb, atol=1e-4, rtol=1e-4), "mismatch vs reference (large)"

    print("KERNEL_OK")
</pallas_src>

<mosaic_0001>
module attributes {stable_mosaic.version = 11 : i64} {
  func.func @_odefunc_kernel(%arg0: i32, %arg1: memref<8x8xf32, #tpu.memory_space<vmem>>, %arg2: memref<8x256xf32, #tpu.memory_space<vmem>>, %arg3: memref<1x256xf32, #tpu.memory_space<vmem>>, %arg4: memref<256x256xf32, #tpu.memory_space<vmem>>, %arg5: memref<1x256xf32, #tpu.memory_space<vmem>>, %arg6: memref<256x256xf32, #tpu.memory_space<vmem>>, %arg7: memref<1x256xf32, #tpu.memory_space<vmem>>, %arg8: memref<256x128xf32, #tpu.memory_space<vmem>>, %arg9: memref<1x128xf32, #tpu.memory_space<vmem>>, %arg10: memref<8x128xf32, #tpu.memory_space<vmem>>) attributes {dimension_semantics = [#tpu.dimension_semantics<parallel>], iteration_bounds = array<i64: 1>, scalar_prefetch = 0 : i64, scratch_operands = 0 : i64, tpu.core_type = #tpu.core_type<tc>, window_params = [{transform_indices = @transform_0, window_bounds = array<i64: 8, 8>}, {pipeline_mode = #tpu.pipeline_mode<synchronous>, transform_indices = @transform_1, window_bounds = array<i64: 8, 256>}, {pipeline_mode = #tpu.pipeline_mode<synchronous>, transform_indices = @transform_2, window_bounds = array<i64: 1, 256>}, {pipeline_mode = #tpu.pipeline_mode<synchronous>, transform_indices = @transform_3, window_bounds = array<i64: 256, 256>}, {pipeline_mode = #tpu.pipeline_mode<synchronous>, transform_indices = @transform_4, window_bounds = array<i64: 1, 256>}, {pipeline_mode = #tpu.pipeline_mode<synchronous>, transform_indices = @transform_5, window_bounds = array<i64: 256, 256>}, {pipeline_mode = #tpu.pipeline_mode<synchronous>, transform_indices = @transform_6, window_bounds = array<i64: 1, 256>}, {pipeline_mode = #tpu.pipeline_mode<synchronous>, transform_indices = @transform_7, window_bounds = array<i64: 256, 128>}, {pipeline_mode = #tpu.pipeline_mode<synchronous>, transform_indices = @transform_8, window_bounds = array<i64: 1, 128>}, {transform_indices = @transform_9, window_bounds = array<i64: 8, 128>}]} {
    %c0 = arith.constant 0 : index
    %c0_0 = arith.constant 0 : index
    %0 = vector.load %arg1[%c0, %c0_0] : memref<8x8xf32, #tpu.memory_space<vmem>>, vector<8x8xf32>
    %c0_1 = arith.constant 0 : index
    %c0_2 = arith.constant 0 : index
    %1 = vector.load %arg2[%c0_1, %c0_2] : memref<8x256xf32, #tpu.memory_space<vmem>>, vector<8x256xf32>
    %cst = arith.constant dense<0.000000e+00> : vector<8x256xf32>
    %2 = tpu.matmul %0, %1, %cst {dimension_numbers = #tpu.dot_dimension_numbers<[1], [0], [0], [1], [0, 0, 1, 1], [], []>} : vector<8x8xf32>, vector<8x256xf32>, vector<8x256xf32> -> vector<8x256xf32>
    %c0_3 = arith.constant 0 : index
    %c0_4 = arith.constant 0 : index
    %3 = vector.load %arg3[%c0_3, %c0_4] : memref<1x256xf32, #tpu.memory_space<vmem>>, vector<1x256xf32>
    %4 = vector.broadcast %3 : vector<1x256xf32> to vector<8x256xf32>
    %5 = arith.addf %2, %4 : vector<8x256xf32>
    %6 = arith.negf %5 : vector<8x256xf32>
    %7 = math.exp %6 : vector<8x256xf32>
    %cst_5 = arith.constant 1.000000e+00 : f32
    %8 = vector.broadcast %cst_5 : f32 to vector<8x256xf32>
    %9 = arith.addf %8, %7 : vector<8x256xf32>
    %10 = arith.divf %8, %9 : vector<8x256xf32>
    %c0_6 = arith.constant 0 : index
    %c0_7 = arith.constant 0 : index
    %11 = vector.load %arg4[%c0_6, %c0_7] : memref<256x256xf32, #tpu.memory_space<vmem>>, vector<256x256xf32>
    %cst_8 = arith.constant dense<0.000000e+00> : vector<8x256xf32>
    %12 = tpu.matmul %10, %11, %cst_8 {dimension_numbers = #tpu.dot_dimension_numbers<[1], [0], [0], [1], [0, 0, 1, 1], [], []>} : vector<8x256xf32>, vector<256x256xf32>, vector<8x256xf32> -> vector<8x256xf32>
    %c0_9 = arith.constant 0 : index
    %c0_10 = arith.constant 0 : index
    %13 = vector.load %arg5[%c0_9, %c0_10] : memref<1x256xf32, #tpu.memory_space<vmem>>, vector<1x256xf32>
    %14 = vector.broadcast %13 : vector<1x256xf32> to vector<8x256xf32>
    %15 = arith.addf %12, %14 : vector<8x256xf32>
    %16 = arith.negf %15 : vector<8x256xf32>
    %17 = math.exp %16 : vector<8x256xf32>
    %cst_11 = arith.constant 1.000000e+00 : f32
    %18 = vector.broadcast %cst_11 : f32 to vector<8x256xf32>
    %19 = arith.addf %18, %17 : vector<8x256xf32>
    %20 = arith.divf %18, %19 : vector<8x256xf32>
    %c0_12 = arith.constant 0 : index
    %c0_13 = arith.constant 0 : index
    %21 = vector.load %arg6[%c0_12, %c0_13] : memref<256x256xf32, #tpu.memory_space<vmem>>, vector<256x256xf32>
    %cst_14 = arith.constant dense<0.000000e+00> : vector<8x256xf32>
    %22 = tpu.matmul %20, %21, %cst_14 {dimension_numbers = #tpu.dot_dimension_numbers<[1], [0], [0], [1], [0, 0, 1, 1], [], []>} : vector<8x256xf32>, vector<256x256xf32>, vector<8x256xf32> -> vector<8x256xf32>
    %c0_15 = arith.constant 0 : index
    %c0_16 = arith.constant 0 : index
    %23 = vector.load %arg7[%c0_15, %c0_16] : memref<1x256xf32, #tpu.memory_space<vmem>>, vector<1x256xf32>
    %24 = vector.broadcast %23 : vector<1x256xf32> to vector<8x256xf32>
    %25 = arith.addf %22, %24 : vector<8x256xf32>
    %26 = arith.negf %25 : vector<8x256xf32>
    %27 = math.exp %26 : vector<8x256xf32>
    %cst_17 = arith.constant 1.000000e+00 : f32
    %28 = vector.broadcast %cst_17 : f32 to vector<8x256xf32>
    %29 = arith.addf %28, %27 : vector<8x256xf32>
    %30 = arith.divf %28, %29 : vector<8x256xf32>
    %c0_18 = arith.constant 0 : index
    %c0_19 = arith.constant 0 : index
    %31 = vector.load %arg8[%c0_18, %c0_19] : memref<256x128xf32, #tpu.memory_space<vmem>>, vector<256x128xf32>
    %cst_20 = arith.constant dense<0.000000e+00> : vector<8x128xf32>
    %32 = tpu.matmul %30, %31, %cst_20 {dimension_numbers = #tpu.dot_dimension_numbers<[1], [0], [0], [1], [0, 0, 1, 1], [], []>} : vector<8x256xf32>, vector<256x128xf32>, vector<8x128xf32> -> vector<8x128xf32>
    %c0_21 = arith.constant 0 : index
    %c0_22 = arith.constant 0 : index
    %33 = vector.load %arg9[%c0_21, %c0_22] : memref<1x128xf32, #tpu.memory_space<vmem>>, vector<1x128xf32>
    %34 = vector.broadcast %33 : vector<1x128xf32> to vector<8x128xf32>
    %35 = arith.addf %32, %34 : vector<8x128xf32>
    %c0_23 = arith.constant 0 : index
    %c0_24 = arith.constant 0 : index
    %36 = vector.load %arg10[%c0_23, %c0_24] : memref<8x128xf32, #tpu.memory_space<vmem>>, vector<8x128xf32>
    tpu.vector_store %arg10[%c0_23, %c0_24], %35 {strides = array<i32>} : memref<8x128xf32, #tpu.memory_space<vmem>>, vector<8x128xf32>,
    return
  }
  func.func @transform_0(%arg0: i32) -> (i32, i32) {
    %c0_i32 = arith.constant 0 : i32
    %c0_i32_0 = arith.constant 0 : i32
    return %arg0, %c0_i32 : i32, i32
  }
  func.func @transform_1(%arg0: i32) -> (i32, i32) {
    %c0_i32 = arith.constant 0 : i32
    %c0_i32_0 = arith.constant 0 : i32
    %c0_i32_1 = arith.constant 0 : i32
    return %c0_i32, %c0_i32_0 : i32, i32
  }
  func.func @transform_2(%arg0: i32) -> (i32, i32) {
    %c0_i32 = arith.constant 0 : i32
    %c0_i32_0 = arith.constant 0 : i32
    %c0_i32_1 = arith.constant 0 : i32
    return %c0_i32, %c0_i32_0 : i32, i32
  }
  func.func @transform_3(%arg0: i32) -> (i32, i32) {
    %c0_i32 = arith.constant 0 : i32
    %c0_i32_0 = arith.constant 0 : i32
    %c0_i32_1 = arith.constant 0 : i32
    return %c0_i32, %c0_i32_0 : i32, i32
  }
  func.func @transform_4(%arg0: i32) -> (i32, i32) {
    %c0_i32 = arith.constant 0 : i32
    %c0_i32_0 = arith.constant 0 : i32
    %c0_i32_1 = arith.constant 0 : i32
    return %c0_i32, %c0_i32_0 : i32, i32
  }
  func.func @transform_5(%arg0: i32) -> (i32, i32) {
    %c0_i32 = arith.constant 0 : i32
    %c0_i32_0 = arith.constant 0 : i32
    %c0_i32_1 = arith.constant 0 : i32
    return %c0_i32, %c0_i32_0 : i32, i32
  }
  func.func @transform_6(%arg0: i32) -> (i32, i32) {
    %c0_i32 = arith.constant 0 : i32
    %c0_i32_0 = arith.constant 0 : i32
    %c0_i32_1 = arith.constant 0 : i32
    return %c0_i32, %c0_i32_0 : i32, i32
  }
  func.func @transform_7(%arg0: i32) -> (i32, i32) {
    %c0_i32 = arith.constant 0 : i32
    %c0_i32_0 = arith.constant 0 : i32
    %c0_i32_1 = arith.constant 0 : i32
    return %c0_i32, %c0_i32_0 : i32, i32
  }
  func.func @transform_8(%arg0: i32) -> (i32, i32) {
    %c0_i32 = arith.constant 0 : i32
    %c0_i32_0 = arith.constant 0 : i32
    %c0_i32_1 = arith.constant 0 : i32
    return %c0_i32, %c0_i32_0 : i32, i32
  }
  func.func @transform_9(%arg0: i32) -> (i32, i32) {
    %c0_i32 = arith.constant 0 : i32
    %c0_i32_0 = arith.constant 0 : i32
    return %arg0, %c0_i32 : i32, i32
  }
}

</mosaic_0001>

<bundles_post_ra>
// kernel: odefunc_forward.1
= control target key start
LH: loop header
LB: loop body
LE: loop exit
PB: predicated region body
PF: predicated region fallthrough
CT: control target
= control target key end

     0   :  { %vm48_vm0 = vcmask 64512   ;;  %v668_v3 = vmov 0.0   ;;  %s1234_s0 = inlined_call_operand.vmem [shape: f32[8,8], index: 0, kind: input, shape index: {}]   ;;  %s1235_s1 = inlined_call_operand.vmem [shape: f32[8,256], index: 1, kind: input, shape index: {}]   ;;  %s1236_s2 = inlined_call_operand.vmem [shape: f32[1,256], index: 2, kind: input, shape index: {}]   ;;  %s1237_s3 = inlined_call_operand.vmem [shape: f32[256,256], index: 3, kind: input, shape index: {}]   ;;  %s1238_s4 = inlined_call_operand.vmem [shape: f32[1,256], index: 4, kind: input, shape index: {}]   ;;  %s1239_s5 = inlined_call_operand.vmem [shape: f32[256,256], index: 5, kind: input, shape index: {}]   ;;  %s1240_s6 = inlined_call_operand.vmem [shape: f32[1,256], index: 6, kind: input, shape index: {}]   ;;  %s1241_s7 = inlined_call_operand.vmem [shape: f32[256,128], index: 7, kind: input, shape index: {}]   ;;  %s1242_s8 = inlined_call_operand.vmem [shape: f32[1,128], index: 8, kind: input, shape index: {}]   ;;  %s1243_s9 = inlined_call_operand.hbm [shape: f32[8,128], index: 9, kind: output, shape index: {}]  }
   0x1   :  { %v35_v0 = vld [vmem:[%s1235_s1 + $0x8] sm:$0xff]  ;;  %v34_v1 = vld [vmem:[%s1235_s1] sm:$0xff]  ;;  %116 = vmatprep.mubr.f32.mxu0 %v668_v3  ;;  %v166_v4 = vld [vmem:[%s1237_s3 + $0xf8] sm:$0xff] }
   0x2   :  { %v33_v2 = vld [vmem:[%s1234_s0] sm:$0xff]  ;;  %82 = vmatprep.subr.mxu0 %v35_v0  ;;  %v165_v5 = vld [vmem:[%s1237_s3 + $0xf0] sm:$0xff]  ;;  %v164_v6 = vld [vmem:[%s1237_s3 + $0xe8] sm:$0xff]  ;;  %211 = vmatprep.subr.mxu1 %v166_v4 }
   0x3   :  { %83 = vmatpush1.msra.mxu0 %v34_v1  ;;  %v163_v7 = vld [vmem:[%s1237_s3 + $0xe0] sm:$0xff]  ;;  %212 = vmatpush1.msra.mxu1 %v165_v5  ;;  %v162_v8 = vld [vmem:[%s1237_s3 + $0xd8] sm:$0xff]  ;;  %v161_v9 = vld [vmem:[%s1237_s3 + $0xd0] sm:$0xff] }
   0x4   :  { %577 = vmatmul.mubr.msk.f32.vlgmr.msra.gmra.mxu0 %vm48_vm0, %v33_v2  ;;  %213 = vmatprep.subr.mxu1 %v164_v6  ;;  %v160_v10 = vld [vmem:[%s1237_s3 + $0xc8] sm:$0xff]  ;;  %v159_v11 = vld [vmem:[%s1237_s3 + $0xc0] sm:$0xff]  ;;  %v158_v12 = vld [vmem:[%s1237_s3 + $0xb8] sm:$0xff] }
   0x5   :  { %214 = vmatpush1.msra.mxu1 %v163_v7  ;;  %v157_v13 = vld [vmem:[%s1237_s3 + $0xb0] sm:$0xff]  ;;  %v156_v14 = vld [vmem:[%s1237_s3 + $0xa8] sm:$0xff]  ;;  %v155_v15 = vld [vmem:[%s1237_s3 + $0xa0] sm:$0xff] }
   0x6   :  { %215 = vmatprep.subr.mxu1 %v162_v8 }
   0x7   :  { %216 = vmatpush1.msra.mxu1 %v161_v9 }
   0x8   :  { %217 = vmatprep.subr.mxu1 %v160_v10 }
   0x9   :  { %218 = vmatpush1.msra.mxu1 %v159_v11 }
   0xa   :  { %219 = vmatprep.subr.mxu1 %v158_v12 }
   0xb   :  { %14 = vsyncpa [#allocation3], 0  ;;  %220 = vmatpush1.msra.mxu1 %v157_v13  ;;  %v154_v16 = vld [vmem:[%s1237_s3 + $0x98] sm:$0xff]  ;;  %v153_v17 = vld [vmem:[%s1237_s3 + $0x90] sm:$0xff]  ;;  %s669_s0 = smov [#allocation2]  }
   0xc   :  { %221 = vmatprep.subr.mxu1 %v156_v14  ;;  %v152_v18 = vld [vmem:[%s1237_s3 + $0x88] sm:$0xff]  ;;  %v151_v19 = vld [vmem:[%s1237_s3 + $0x80] sm:$0xff]  ;;  %v150_v20 = vld [vmem:[%s1237_s3 + $0x78] sm:$0xff]  ;;  %s569_s21 = sshll.u32 %s669_s0, 4  ;;  %s570_s21 = int_to_ptr.vmem [resolvable:$true] %s569_s21 }
   0xd   :  { %222 = vmatpush1.msra.mxu1 %v155_v15  ;;  %v149_v21 = vld [vmem:[%s1237_s3 + $0x70] sm:$0xff]  ;;  %v148_v22 = vld [vmem:[%s1237_s3 + $0x68] sm:$0xff]  ;;  %v147_v23 = vld [vmem:[%s1237_s3 + $0x60] sm:$0xff]  ;;  %s646_s22 = scalar_lea.vmem %s570_s21, 128  ;;  %p651_p1 = scmp.lt.s32.totalorder %s570_s21, %s570_s21 }
   0xe   :  { %223 = vmatprep.subr.mxu1 %v154_v16  ;;  %v146_v24 = vld [vmem:[%s1237_s3 + $0x58] sm:$0xff]  ;;  %v145_v25 = vld [vmem:[%s1237_s3 + $0x50] sm:$0xff]  ;;  %v144_v26 = vld [vmem:[%s1237_s3 + $0x48] sm:$0xff]  ;;  %p647_p0 = scmp.ne.s32.totalorder %s570_s21, %s646_s22  ;;  %p652_p2 = scmp.lt.s32.totalorder %s646_s22, %s646_s22 }
   0xf   :  { %224 = vmatpush1.msra.mxu1 %v153_v17  ;;  %v143_v27 = vld [vmem:[%s1237_s3 + $0x40] sm:$0xff]  ;;  %v142_v28 = vld [vmem:[%s1237_s3 + $0x38] sm:$0xff]  ;;  %v141_v29 = vld [vmem:[%s1237_s3 + $0x30] sm:$0xff] }
  0x10   :  { %225 = vmatprep.subr.mxu1 %v152_v18  ;;  %v140_v30 = vld [vmem:[%s1237_s3 + $0x28] sm:$0xff]  ;;  %v139_v31 = vld [vmem:[%s1237_s3 + $0x20] sm:$0xff]  ;;  %v138_v32 = vld [vmem:[%s1237_s3 + $0x18] sm:$0xff]  ;;  %p653_p3 = por %p652_p2, %p651_p1 }
  0x11   :  { %226 = vmatpush1.msra.mxu1 %v151_v19  ;;  %v137_v33 = vld [vmem:[%s1237_s3 + $0x10] sm:$0xff]  ;;  %v136_v34 = vld [vmem:[%s1237_s3 + $0x8] sm:$0xff]  ;;  %v135_v35 = vld [vmem:[%s1237_s3] sm:$0xff] }
  0x12   :  { %227 = vmatprep.subr.mxu1 %v150_v20  ;;  %v198_v36 = vld [vmem:[%s1237_s3 + $0x1f8] sm:$0xff]  ;;  %v197_v37 = vld [vmem:[%s1237_s3 + $0x1f0] sm:$0xff]  ;;  %v196_v38 = vld [vmem:[%s1237_s3 + $0x1e8] sm:$0xff]  ;;  %p654_p4 = pnand %p653_p3, %p647_p0 }
  0x13   :  { %228 = vmatpush1.msra.mxu1 %v149_v21  ;;  %v195_v39 = vld [vmem:[%s1237_s3 + $0x1e0] sm:$0xff]  ;;  %v194_v40 = vld [vmem:[%s1237_s3 + $0x1d8] sm:$0xff]  ;;  %v193_v41 = vld [vmem:[%s1237_s3 + $0x1d0] sm:$0xff] }
  0x14   :  { %229 = vmatprep.subr.mxu1 %v148_v22  ;;  %v192_v42 = vld [vmem:[%s1237_s3 + $0x1c8] sm:$0xff]  ;;  %v191_v43 = vld [vmem:[%s1237_s3 + $0x1c0] sm:$0xff]  ;;  %v190_v44 = vld [vmem:[%s1237_s3 + $0x1b8] sm:$0xff] }
  0x15   :  { %230 = vmatpush1.msra.mxu1 %v147_v23  ;;  %v189_v45 = vld [vmem:[%s1237_s3 + $0x1b0] sm:$0xff]  ;;  %v188_v46 = vld [vmem:[%s1237_s3 + $0x1a8] sm:$0xff]  ;;  %v187_v47 = vld [vmem:[%s1237_s3 + $0x1a0] sm:$0xff] }
  0x16   :  { %231 = vmatprep.subr.mxu1 %v146_v24  ;;  %v186_v48 = vld [vmem:[%s1237_s3 + $0x198] sm:$0xff]  ;;  %v185_v49 = vld [vmem:[%s1237_s3 + $0x190] sm:$0xff]  ;;  %v184_v50 = vld [vmem:[%s1237_s3 + $0x188] sm:$0xff] }
  0x17   :  { %232 = vmatpush1.msra.mxu1 %v145_v25  ;;  %v183_v51 = vld [vmem:[%s1237_s3 + $0x180] sm:$0xff]  ;;  %v182_v52 = vld [vmem:[%s1237_s3 + $0x178] sm:$0xff]  ;;  %v181_v53 = vld [vmem:[%s1237_s3 + $0x170] sm:$0xff] }
  0x18   :  { %233 = vmatprep.subr.mxu1 %v144_v26  ;;  %v180_v54 = vld [vmem:[%s1237_s3 + $0x168] sm:$0xff]  ;;  %v179_v55 = vld [vmem:[%s1237_s3 + $0x160] sm:$0xff]  ;;  %v178_v56 = vld [vmem:[%s1237_s3 + $0x158] sm:$0xff] }
  0x19   :  { %234 = vmatpush1.msra.mxu1 %v143_v27  ;;  %v177_v57 = vld [vmem:[%s1237_s3 + $0x150] sm:$0xff]  ;;  %v176_v58 = vld [vmem:[%s1237_s3 + $0x148] sm:$0xff]  ;;  %v175_v59 = vld [vmem:[%s1237_s3 + $0x140] sm:$0xff] }
  0x1a   :  { %235 = vmatprep.subr.mxu1 %v142_v28  ;;  %v174_v60 = vld [vmem:[%s1237_s3 + $0x138] sm:$0xff]  ;;  %v173_v61 = vld [vmem:[%s1237_s3 + $0x130] sm:$0xff]  ;;  %v172_v62 = vld [vmem:[%s1237_s3 + $0x128] sm:$0xff] }
  0x1b   :  { %236 = vmatpush1.msra.mxu1 %v141_v29  ;;  %v171_v63 = vld [vmem:[%s1237_s3 + $0x120] sm:$0xff]  ;;  %v170_v0 = vld [vmem:[%s1237_s3 + $0x118] sm:$0xff]  ;;  %v169_v1 = vld [vmem:[%s1237_s3 + $0x110] sm:$0xff] }
  0x1c   :  { %237 = vmatprep.subr.mxu1 %v140_v30  ;;  %v168_v2 = vld [vmem:[%s1237_s3 + $0x108] sm:$0xff]  ;;  %v167_v3 = vld [vmem:[%s1237_s3 + $0x100] sm:$0xff]  ;;  %v325_v4 = vld [vmem:[%s1239_s5 + $0xf8] sm:$0xff]  ;;  %v38_v30 = vlaneseq }
  0x1d   :  { %238 = vmatpush1.msra.mxu1 %v139_v31  ;;  %v324_v5 = vld [vmem:[%s1239_s5 + $0xf0] sm:$0xff]  ;;  %v323_v6 = vld [vmem:[%s1239_s5 + $0xe8] sm:$0xff]  ;;  %370 = vmatprep.subr.mxu0 %v325_v4  ;;  %v322_v7 = vld [vmem:[%s1239_s5 + $0xe0] sm:$0xff] }
  0x1e   :  { %239 = vmatprep.subr.mxu1 %v138_v32  ;;  %371 = vmatpush1.msra.mxu0 %v324_v5  ;;  %v321_v8 = vld [vmem:[%s1239_s5 + $0xd8] sm:$0xff]  ;;  %v320_v9 = vld [vmem:[%s1239_s5 + $0xd0] sm:$0xff]  ;;  %v319_v10 = vld [vmem:[%s1239_s5 + $0xc8] sm:$0xff]  ;;  %v39_v31 = vshrl.u32 %v38_v30, 7 }
  0x1f   :  { %240 = vmatpush1.msra.mxu1 %v137_v33  ;;  %372 = vmatprep.subr.mxu0 %v323_v6  ;;  %v318_v11 = vld [vmem:[%s1239_s5 + $0xc0] sm:$0xff]  ;;  %v317_v12 = vld [vmem:[%s1239_s5 + $0xb8] sm:$0xff]  ;;  %v316_v13 = vld [vmem:[%s1239_s5 + $0xb0] sm:$0xff] }
  0x20   :  { %241 = vmatprep.subr.mxu1 %v136_v34  ;;  %373 = vmatpush1.msra.mxu0 %v322_v7  ;;  %v315_v14 = vld [vmem:[%s1239_s5 + $0xa8] sm:$0xff]  ;;  %v314_v15 = vld [vmem:[%s1239_s5 + $0xa0] sm:$0xff]  ;;  %v313_v16 = vld [vmem:[%s1239_s5 + $0x98] sm:$0xff]  ;;  %v999_v32 = vsub.s32 0, %v39_v31  ;;  %v1004_v34 = vsub.s32 1, %v39_v31 }
  0x21   :  { %242 = vmatpush1.msra.mxu1 %v135_v35  ;;  %374 = vmatprep.subr.mxu0 %v321_v8  ;;  %v312_v17 = vld [vmem:[%s1239_s5 + $0x90] sm:$0xff]  ;;  %v311_v18 = vld [vmem:[%s1239_s5 + $0x88] sm:$0xff]  ;;  %v310_v19 = vld [vmem:[%s1239_s5 + $0x80] sm:$0xff] }
  0x22   :  { %243 = vmatprep.subr.mxu1 %v198_v36  ;;  %375 = vmatpush1.msra.mxu0 %v320_v9  ;;  %v309_v20 = vld [vmem:[%s1239_s5 + $0x78] sm:$0xff]  ;;  %v308_v21 = vld [vmem:[%s1239_s5 + $0x70] sm:$0xff]  ;;  %v307_v22 = vld [vmem:[%s1239_s5 + $0x68] sm:$0xff] }
  0x23   :  { %244 = vmatpush2.msra.mxu1 %v197_v37  ;;  %376 = vmatprep.subr.mxu0 %v319_v10  ;;  %v306_v23 = vld [vmem:[%s1239_s5 + $0x60] sm:$0xff]  ;;  %v305_v24 = vld [vmem:[%s1239_s5 + $0x58] sm:$0xff]  ;;  %v304_v25 = vld [vmem:[%s1239_s5 + $0x50] sm:$0xff] }
  0x24   :  { %245 = vmatprep.subr.mxu1 %v196_v38  ;;  %377 = vmatpush1.msra.mxu0 %v318_v11  ;;  %v303_v26 = vld [vmem:[%s1239_s5 + $0x48] sm:$0xff]  ;;  %v302_v27 = vld [vmem:[%s1239_s5 + $0x40] sm:$0xff]  ;;  %v301_v28 = vld [vmem:[%s1239_s5 + $0x38] sm:$0xff] }
  0x25   :  { %246 = vmatpush2.msra.mxu1 %v195_v39  ;;  %378 = vmatprep.subr.mxu0 %v317_v12  ;;  %v300_v29 = vld [vmem:[%s1239_s5 + $0x30] sm:$0xff]  ;;  %v36_v33 = vld [vmem:[%s1236_s2] sm:$0x3]  ;;  %v343_v5 = vld [vmem:[%s1239_s5 + $0x188] sm:$0xff] }
  0x26   :  { %247 = vmatprep.subr.mxu1 %v194_v40  ;;  %379 = vmatpush1.msra.mxu0 %v316_v13  ;;  %v41_v35 = vrot.slane %v36_v33, %v999_v32  ;;  %v45_v36 = vrot.slane %v36_v33, %v1004_v34  ;;  %v344_v4 = vld [vmem:[%s1239_s5 + $0x190] sm:$0xff]  ;;  %v342_v6 = vld [vmem:[%s1239_s5 + $0x180] sm:$0xff]  ;;  %v341_v7 = vld [vmem:[%s1239_s5 + $0x178] sm:$0xff] }
  0x27   :  { %248 = vmatpush2.msra.mxu1 %v193_v41  ;;  %380 = vmatprep.subr.mxu0 %v315_v14  ;;  %v340_v8 = vld [vmem:[%s1239_s5 + $0x170] sm:$0xff]  ;;  %v339_v9 = vld [vmem:[%s1239_s5 + $0x168] sm:$0xff]  ;;  %v338_v10 = vld [vmem:[%s1239_s5 + $0x160] sm:$0xff] }
  0x28   :  { %249 = vmatprep.subr.mxu1 %v192_v42  ;;  %381 = vmatpush1.msra.mxu0 %v314_v15  ;;  %v337_v11 = vld [vmem:[%s1239_s5 + $0x158] sm:$0xff]  ;;  %v336_v12 = vld [vmem:[%s1239_s5 + $0x150] sm:$0xff]  ;;  %v335_v13 = vld [vmem:[%s1239_s5 + $0x148] sm:$0xff] }
  0x29   :  { %250 = vmatpush2.msra.mxu1 %v191_v43  ;;  %382 = vmatprep.subr.mxu0 %v313_v16  ;;  %v334_v14 = vld [vmem:[%s1239_s5 + $0x140] sm:$0xff]  ;;  %v333_v15 = vld [vmem:[%s1239_s5 + $0x138] sm:$0xff]  ;;  %v332_v16 = vld [vmem:[%s1239_s5 + $0x130] sm:$0xff] }
  0x2a   :  { %251 = vmatprep.subr.mxu1 %v190_v44  ;;  %383 = vmatpush1.msra.mxu0 %v312_v17  ;;  %v331_v17 = vld [vmem:[%s1239_s5 + $0x128] sm:$0xff] }
  0x2b   :  { %252 = vmatpush2.msra.mxu1 %v189_v45  ;;  %384 = vmatprep.subr.mxu0 %v311_v18  ;;  %v330_v18 = vld [vmem:[%s1239_s5 + $0x120] sm:$0xff] }
  0x2c   :  { %253 = vmatprep.subr.mxu1 %v188_v46  ;;  %385 = vmatpush1.msra.mxu0 %v310_v19  ;;  %v329_v19 = vld [vmem:[%s1239_s5 + $0x118] sm:$0xff] }
  0x2d   :  { %254 = vmatpush2.msra.mxu1 %v187_v47  ;;  %386 = vmatprep.subr.mxu0 %v309_v20  ;;  %v328_v20 = vld [vmem:[%s1239_s5 + $0x110] sm:$0xff] }
  0x2e   :  { %255 = vmatprep.subr.mxu1 %v186_v48  ;;  %387 = vmatpush1.msra.mxu0 %v308_v21  ;;  %v327_v21 = vld [vmem:[%s1239_s5 + $0x108] sm:$0xff] }
  0x2f   :  { %256 = vmatpush2.msra.mxu1 %v185_v49  ;;  %388 = vmatprep.subr.mxu0 %v307_v22  ;;  %v299_v49 = vld [vmem:[%s1239_s5 + $0x28] sm:$0xff]  ;;  %v326_v22 = vld [vmem:[%s1239_s5 + $0x100] sm:$0xff] }
  0x30   :  { %257 = vmatprep.subr.mxu1 %v184_v50  ;;  %389 = vmatpush1.msra.mxu0 %v306_v23  ;;  %v298_v50 = vld [vmem:[%s1239_s5 + $0x20] sm:$0xff] }
  0x31   :  { %258 = vmatpush2.msra.mxu1 %v183_v51  ;;  %390 = vmatprep.subr.mxu0 %v305_v24  ;;  %v297_v51 = vld [vmem:[%s1239_s5 + $0x18] sm:$0xff]  ;;  %v199_v23 = vld [vmem:[%s1238_s4] sm:$0x3] }
  0x32   :  { %259 = vmatprep.subr.mxu1 %v182_v52  ;;  %391 = vmatpush1.msra.mxu0 %v304_v25  ;;  %v296_v52 = vld [vmem:[%s1239_s5 + $0x10] sm:$0xff]  ;;  %v204_v24 = vrot.slane %v199_v23, %v999_v32  ;;  %v208_v25 = vrot.slane %v199_v23, %v1004_v34  ;;  %v584_v23 = vld [vmem:[%s1242_s8] ss:$0 sm:$0xff] }
  0x33   :  { %260 = vmatpush2.msra.mxu1 %v181_v53  ;;  %392 = vmatprep.subr.mxu0 %v303_v26  ;;  %v295_v53 = vld [vmem:[%s1239_s5 + $0x8] sm:$0xff] }
  0x34   :  { %261 = vmatprep.subr.mxu1 %v180_v54  ;;  %393 = vmatpush1.msra.mxu0 %v302_v27  ;;  %v294_v54 = vld [vmem:[%s1239_s5] sm:$0xff] }
  0x35   :  { %262 = vmatpush2.msra.mxu1 %v179_v55  ;;  %394 = vmatprep.subr.mxu0 %v301_v28  ;;  %v357_v55 = vld [vmem:[%s1239_s5 + $0x1f8] sm:$0xff] }
  0x36   :  { %263 = vmatprep.subr.mxu1 %v178_v56  ;;  %395 = vmatpush1.msra.mxu0 %v300_v29  ;;  %v356_v56 = vld [vmem:[%s1239_s5 + $0x1f0] sm:$0xff] }
  0x37   :  { %264 = vmatpush2.msra.mxu1 %v177_v57  ;;  %396 = vmatprep.subr.mxu0 %v299_v49  ;;  %v355_v57 = vld [vmem:[%s1239_s5 + $0x1e8] sm:$0xff]  ;;  %v464_v49 = vld [vmem:[%s1241_s7 + $0x58] sm:$0xff] }
  0x38   :  { %265 = vmatprep.subr.mxu1 %v176_v58  ;;  %397 = vmatpush1.msra.mxu0 %v298_v50  ;;  %v354_v58 = vld [vmem:[%s1239_s5 + $0x1e0] sm:$0xff]  ;;  %v479_v50 = vld [vmem:[%s1241_s7 + $0xd0] sm:$0xff] }
  0x39   :  { %266 = vmatpush2.msra.mxu1 %v175_v59  ;;  %398 = vmatprep.subr.mxu0 %v297_v51  ;;  %v353_v59 = vld [vmem:[%s1239_s5 + $0x1d8] sm:$0xff]  ;;  %v463_v51 = vld [vmem:[%s1241_s7 + $0x50] sm:$0xff] }
  0x3a   :  { %267 = vmatprep.subr.mxu1 %v174_v60  ;;  %399 = vmatpush1.msra.mxu0 %v296_v52  ;;  %v352_v60 = vld [vmem:[%s1239_s5 + $0x1d0] sm:$0xff]  ;;  %v478_v52 = vld [vmem:[%s1241_s7 + $0xc8] sm:$0xff] }
  0x3b   :  { %268 = vmatpush2.msra.mxu1 %v173_v61  ;;  %400 = vmatprep.subr.mxu0 %v295_v53  ;;  %v351_v61 = vld [vmem:[%s1239_s5 + $0x1c8] sm:$0xff] }
  0x3c   :  { %269 = vmatprep.subr.mxu1 %v172_v62  ;;  %401 = vmatpush1.msra.mxu0 %v294_v54  ;;  %v350_v62 = vld [vmem:[%s1239_s5 + $0x1c0] sm:$0xff]  ;;  %v462_v53 = vld [vmem:[%s1241_s7 + $0x48] sm:$0xff] }
  0x3d   :  { %270 = vmatpush2.msra.mxu1 %v171_v63  ;;  %402 = vmatprep.subr.mxu0 %v357_v55  ;;  %v349_v63 = vld [vmem:[%s1239_s5 + $0x1b8] sm:$0xff]  ;;  %v477_v54 = vld [vmem:[%s1241_s7 + $0xc0] sm:$0xff] }
  0x3e   :  { %271 = vmatprep.subr.mxu1 %v170_v0  ;;  %403 = vmatpush2.msra.mxu0 %v356_v56  ;;  %v348_v0 = vld [vmem:[%s1239_s5 + $0x1b0] sm:$0xff]  ;;  %v461_v55 = vld [vmem:[%s1241_s7 + $0x40] sm:$0xff]  ;;  %v476_v56 = vld [vmem:[%s1241_s7 + $0xb8] sm:$0xff] }
  0x3f   :  { %272 = vmatpush2.msra.mxu1 %v169_v1  ;;  %404 = vmatprep.subr.mxu0 %v355_v57  ;;  %v347_v1 = vld [vmem:[%s1239_s5 + $0x1a8] sm:$0xff]  ;;  %v460_v57 = vld [vmem:[%s1241_s7 + $0x38] sm:$0xff] }
  0x40   :  { %273 = vmatprep.subr.mxu1 %v168_v2  ;;  %405 = vmatpush2.msra.mxu0 %v354_v58  ;;  %v346_v2 = vld [vmem:[%s1239_s5 + $0x1a0] sm:$0xff]  ;;  %v475_v58 = vld [vmem:[%s1241_s7 + $0xb0] sm:$0xff] }
  0x41   :  { %274 = vmatpush2.msra.mxu1 %v167_v3  ;;  %406 = vmatprep.subr.mxu0 %v353_v59  ;;  %v345_v3 = vld [vmem:[%s1239_s5 + $0x198] sm:$0xff]  ;;  %v459_v59 = vld [vmem:[%s1241_s7 + $0x30] sm:$0xff] }
  0x42   :  { %407 = vmatpush2.msra.mxu0 %v352_v60  ;;  %v474_v60 = vld [vmem:[%s1241_s7 + $0xa8] sm:$0xff] }
  0x43   :  { %408 = vmatprep.subr.mxu0 %v351_v61  ;;  %v458_v61 = vld [vmem:[%s1241_s7 + $0x28] sm:$0xff] }
  0x44   :  { %409 = vmatpush2.msra.mxu0 %v350_v62  ;;  %v473_v62 = vld [vmem:[%s1241_s7 + $0xa0] sm:$0xff] }
  0x45   :  { %410 = vmatprep.subr.mxu0 %v349_v63  ;;  %v457_v63 = vld [vmem:[%s1241_s7 + $0x20] sm:$0xff] }
  0x46   :  { %411 = vmatpush2.msra.mxu0 %v348_v0  ;;  %v472_v0 = vld [vmem:[%s1241_s7 + $0x98] sm:$0xff] }
  0x47   :  { %412 = vmatprep.subr.mxu0 %v347_v1  ;;  %v456_v1 = vld [vmem:[%s1241_s7 + $0x18] sm:$0xff] }
  0x48   :  { %413 = vmatpush2.msra.mxu0 %v346_v2  ;;  %v471_v2 = vld [vmem:[%s1241_s7 + $0x90] sm:$0xff] }
  0x49   :  { %414 = vmatprep.subr.mxu0 %v345_v3  ;;  %v455_v3 = vld [vmem:[%s1241_s7 + $0x10] sm:$0xff] }
  0x4a   :  { %415 = vmatpush2.msra.mxu0 %v344_v4  ;;  %v470_v4 = vld [vmem:[%s1241_s7 + $0x88] sm:$0xff] }
  0x4b   :  { %416 = vmatprep.subr.mxu0 %v343_v5  ;;  %v454_v5 = vld [vmem:[%s1241_s7 + $0x8] sm:$0xff] }
  0x4c   :  { %417 = vmatpush2.msra.mxu0 %v342_v6  ;;  %v469_v6 = vld [vmem:[%s1241_s7 + $0x80] sm:$0xff] }
  0x4d   :  { %418 = vmatprep.subr.mxu0 %v341_v7  ;;  %v453_v7 = vld [vmem:[%s1241_s7] sm:$0xff] }
  0x4e   :  { %419 = vmatpush2.msra.mxu0 %v340_v8  ;;  %v358_v8 = vld [vmem:[%s1240_s6] sm:$0x3] }
  0x4f   :  { %420 = vmatprep.subr.mxu0 %v339_v9  ;;  %v363_v9 = vrot.slane %v358_v8, %v999_v32 }
  0x50   :  { %421 = vmatpush2.msra.mxu0 %v338_v10  ;;  %v367_v10 = vrot.slane %v358_v8, %v1004_v34 }
  0x51   :  { %422 = vmatprep.subr.mxu0 %v337_v11 }
  0x52   :  { %423 = vmatpush2.msra.mxu0 %v336_v12 }
  0x53   :  { %424 = vmatprep.subr.mxu0 %v335_v13 }
  0x54   :  { %425 = vmatpush2.msra.mxu0 %v334_v14 }
  0x55   :  { %426 = vmatprep.subr.mxu0 %v333_v15 }
  0x56   :  { %427 = vmatpush2.msra.mxu0 %v332_v16 }
  0x57   :  { %428 = vmatprep.subr.mxu0 %v331_v17 }
  0x58   :  { %429 = vmatpush2.msra.mxu0 %v330_v18 }
  0x59   :  { %430 = vmatprep.subr.mxu0 %v329_v19 }
  0x5a   :  { %431 = vmatpush2.msra.mxu0 %v328_v20 }
  0x5b   :  { %432 = vmatprep.subr.mxu0 %v327_v21 }
  0x5c   :  { %433 = vmatpush2.msra.mxu0 %v326_v22 }
  0xc4   :  { %v118_v37 = vpop.f32.mrf.mxu0 }
  0xc5   :  { %v119_v38 = vadd.f32 %v118_v37, %v41_v35 }
  0xc6   :  { %v120_v39 = vpop.f32.mrf.mxu0 }
  0xc7   :  { %v578_v40 = vmul.f32 -1.442695, %v119_v38  ;;  %v121_v41 = vadd.f32 %v120_v39, %v45_v36 }
  0xc9   :  { %622 = vpow2.f32 %v578_v40  ;;  %v579_v42 = vmul.f32 -1.442695, %v121_v41  ;;  %v484_v40 = vld [vmem:[%s1241_s7 + $0xf8] sm:$0xff] }
  0xca   :  { %585 = vmatprep.subr.mxu1 %v484_v40  ;;  %v468_v41 = vld [vmem:[%s1241_s7 + $0x78] sm:$0xff] }
  0xcb   :  { %624 = vpow2.f32 %v579_v42  ;;  %v483_v42 = vld [vmem:[%s1241_s7 + $0xf0] sm:$0xff] }
  0xd6   :  { %v623_v43 = vpop.eup %622 }
  0xd7   :  { %v129_v45 = vadd.f32 1.0, %v623_v43  ;;  %v467_v43 = vld [vmem:[%s1241_s7 + $0x70] sm:$0xff] }
  0xd8   :  { %v625_v44 = vpop.eup %624 }
  0xd9   :  { %v130_v46 = vadd.f32 1.0, %v625_v44  ;;  %v482_v44 = vld [vmem:[%s1241_s7 + $0xe8] sm:$0xff] }
  0xdb   :  { %626 = vrcp.f32 %v130_v46  ;;  %v481_v46 = vld [vmem:[%s1241_s7 + $0xe0] sm:$0xff] }
  0xdc   :  { %628 = vrcp.f32 %v129_v45  ;;  %v466_v45 = vld [vmem:[%s1241_s7 + $0x68] sm:$0xff] }
  0xe8   :  { %v627_v47 = vpop.eup %626 }
  0xe9   :  { %v629_v48 = vpop.eup %628  ;;  %275 = vmatprep.mubr.f32.mxu1 %v627_v47  ;;  %v465_v47 = vld [vmem:[%s1241_s7 + $0x60] sm:$0xff] }
  0xea   :  { %276 = vmatmul.mubr.f32.vlgmr.msra.gmra.mxu1 %v629_v48  ;;  %v480_v48 = vld [vmem:[%s1241_s7 + $0xd8] sm:$0xff] }
  0xeb   :  { %586 = vmatpush3.msra.mxu1 %v468_v41 }
  0xec   :  { %587 = vmatprep.subr.mxu1 %v483_v42 }
  0xed   :  { %588 = vmatpush3.msra.mxu1 %v467_v43 }
  0xee   :  { %589 = vmatprep.subr.mxu1 %v482_v44 }
  0xef   :  { %590 = vmatpush3.msra.mxu1 %v466_v45 }
  0xf0   :  { %591 = vmatprep.subr.mxu1 %v481_v46 }
  0xf1   :  { %592 = vmatpush3.msra.mxu1 %v465_v47 }
  0xf2   :  { %593 = vmatprep.subr.mxu1 %v480_v48 }
  0xf3   :  { %594 = vmatpush3.msra.mxu1 %v464_v49 }
  0xf4   :  { %595 = vmatprep.subr.mxu1 %v479_v50 }
  0xf5   :  { %596 = vmatpush3.msra.mxu1 %v463_v51 }
  0xf6   :  { %597 = vmatprep.subr.mxu1 %v478_v52 }
  0xf7   :  { %598 = vmatpush3.msra.mxu1 %v462_v53 }
  0xf8   :  { %599 = vmatprep.subr.mxu1 %v477_v54 }
  0xf9   :  { %600 = vmatpush3.msra.mxu1 %v461_v55 }
  0xfa   :  { %601 = vmatprep.subr.mxu1 %v476_v56 }
  0xfb   :  { %602 = vmatpush3.msra.mxu1 %v460_v57 }
  0xfc   :  { %603 = vmatprep.subr.mxu1 %v475_v58 }
  0xfd   :  { %604 = vmatpush3.msra.mxu1 %v459_v59 }
  0xfe   :  { %605 = vmatprep.subr.mxu1 %v474_v60 }
  0xff   :  { %606 = vmatpush3.msra.mxu1 %v458_v61 }
 0x100   :  { %607 = vmatprep.subr.mxu1 %v473_v62 }
 0x101   :  { %608 = vmatpush3.msra.mxu1 %v457_v63 }
 0x102   :  { %609 = vmatprep.subr.mxu1 %v472_v0 }
 0x103   :  { %610 = vmatpush3.msra.mxu1 %v456_v1 }
 0x104   :  { %611 = vmatprep.subr.mxu1 %v471_v2 }
 0x105   :  { %612 = vmatpush3.msra.mxu1 %v455_v3 }
 0x106   :  { %613 = vmatprep.subr.mxu1 %v470_v4 }
 0x107   :  { %614 = vmatpush3.msra.mxu1 %v454_v5 }
 0x108   :  { %615 = vmatprep.subr.mxu1 %v469_v6 }
 0x109   :  { %616 = vmatpush3.msra.mxu1 %v453_v7 }
 0x1aa   :  { %v277_v26 = vpop.f32.mrf.mxu1 }
 0x1ab   :  { %v278_v27 = vadd.f32 %v277_v26, %v204_v24 }
 0x1ac   :  { %v279_v28 = vpop.f32.mrf.mxu1 }
 0x1ad   :  { %v580_v29 = vmul.f32 -1.442695, %v278_v27  ;;  %v280_v30 = vadd.f32 %v279_v28, %v208_v25 }
 0x1af   :  { %630 = vpow2.f32 %v580_v29  ;;  %v581_v31 = vmul.f32 -1.442695, %v280_v30 }
 0x1b1   :  { %632 = vpow2.f32 %v581_v31 }
 0x1bc   :  { %v631_v33 = vpop.eup %630 }
 0x1bd   :  { %v288_v36 = vadd.f32 1.0, %v631_v33 }
 0x1be   :  { %v633_v35 = vpop.eup %632 }
 0x1bf   :  { %v289_v37 = vadd.f32 1.0, %v633_v35 }
 0x1c1   :  { %634 = vrcp.f32 %v289_v37 }
 0x1c2   :  { %636 = vrcp.f32 %v288_v36 }
 0x1ce   :  { %v635_v38 = vpop.eup %634 }
 0x1cf   :  { %v637_v39 = vpop.eup %636  ;;  %434 = vmatprep.mubr.f32.mxu0 %v635_v38 }
 0x1d0   :  { %435 = vmatmul.mubr.f32.vlgmr.msra.gmra.mxu0 %v637_v39 }
 0x290   :  { %v436_v11 = vpop.f32.mrf.mxu0 }
 0x291   :  { %v437_v12 = vadd.f32 %v436_v11, %v363_v9 }
 0x292   :  { %v438_v13 = vpop.f32.mrf.mxu0 }
 0x293   :  { %v582_v14 = vmul.f32 -1.442695, %v437_v12  ;;  %v439_v15 = vadd.f32 %v438_v13, %v367_v10 }
 0x295   :  { %638 = vpow2.f32 %v582_v14  ;;  %v583_v16 = vmul.f32 -1.442695, %v439_v15 }
 0x297   :  { %640 = vpow2.f32 %v583_v16 }
 0x2a2   :  { %v639_v17 = vpop.eup %638 }
 0x2a3   :  { %v447_v19 = vadd.f32 1.0, %v639_v17 }
 0x2a4   :  { %v641_v18 = vpop.eup %640 }
 0x2a5   :  { %v448_v20 = vadd.f32 1.0, %v641_v18 }
 0x2a7   :  { %642 = vrcp.f32 %v448_v20 }
 0x2a8   :  { %644 = vrcp.f32 %v447_v19 }
 0x2b4   :  { %v643_v21 = vpop.eup %642 }
 0x2b5   :  { %v645_v22 = vpop.eup %644  ;;  %556 = vmatprep.mubr.f32.mxu1 %v643_v21 }
 0x2b6   :  { %557 = vmatmul.mubr.f32.vlgmr.msra.gmra.mxu1 %v645_v22 }
 0x376   :  { %v617_v32 = vpop.f32.mrf.mxu1 }
 0x378   :  { %v618_v34 = vpop.f32.mrf.mxu1 }
 0x379   :  { %v619_v24 = vadd.f32 %v618_v34, %v617_v32 }
 0x37b   :  { %v559_v25 = vadd.f32 %v619_v24, %v584_v23 }
 0x37d   :  { %562 = vst [vmem:[#allocation2] sm:$0xff] %v559_v25 }
 0x37e   :  { %657 = shalt.err (!%p654_p4)
}
 0x37f   :  { %572 = dma.vmem_to_hbm [thread:$0]  %s570_s21, 128, %s1243_s9, [#allocation3]  }
 0x380   :  { %666 = dma.done.wait [#allocation3], 128  }
 0x381   :  { %667 = vsyncadd [#allocation3], 4294967168 }
 0x382   :  { %576 = vsyncpa [#allocation3], 1 }

</bundles_post_ra>
